<compile_context>
chip_gen: v7x
topology: tpu7x:2x2x1
jax: 0.10.0
libtpu: 0.0.40
codegen_flags: <defaults>
</compile_context>

<pallas_src>
import jax
import jax.numpy as jnp
from jax.experimental import pallas as pl
from jax.experimental.pallas import tpu as pltpu

H = 100        # hidden width, fixed by the module's __init__
LANE = 128
SUBLANE = 8


def _round_up(n, m):
    return ((n + m - 1) // m) * m


def _mlp_kernel(x_ref, w0_ref, b0_ref, w1_ref, b1_ref, w2_ref, b2_ref, o_ref):
    # x_ref: (TB, din_p) bf16; w*: bf16 padded; b*: (1, n) f32; o_ref: (TB, dout_p) f32
    x = x_ref[...]
    # layer 0: Linear + tanh (f32 accumulation / activation — v5e has no bf16 VPU/EUP)
    h0 = jnp.dot(x, w0_ref[...], preferred_element_type=jnp.float32) + b0_ref[...]
    h0 = jnp.tanh(h0)
    # layer 1: Linear + relu
    h1 = jnp.dot(h0.astype(jnp.bfloat16), w1_ref[...],
                 preferred_element_type=jnp.float32) + b1_ref[...]
    h1 = jnp.maximum(h1, 0.0)
    # layer 2: Linear (no activation)
    out = jnp.dot(h1.astype(jnp.bfloat16), w2_ref[...],
                  preferred_element_type=jnp.float32) + b2_ref[...]
    o_ref[...] = out.astype(o_ref.dtype)


def init_params(key, dim_in, dim_out, dtype=jnp.float32):
    """Mimics nn.Linear init: uniform(-1/sqrt(fan_in), 1/sqrt(fan_in)).
    Weights stored as (in, out) so the kernel computes x @ W + b (== x @ W.T + b in torch)."""
    ks = jax.random.split(key, 6)

    def lin(kw, kb, fan_in, fan_out):
        bound = 1.0 / jnp.sqrt(jnp.array(fan_in, dtype))
        w = jax.random.uniform(kw, (fan_in, fan_out), dtype, -bound, bound)
        b = jax.random.uniform(kb, (1, fan_out), dtype, -bound, bound)
        return w, b

    w0, b0 = lin(ks[0], ks[1], dim_in, H)
    w1, b1 = lin(ks[2], ks[3], H, H)
    w2, b2 = lin(ks[4], ks[5], H, dim_out)
    return dict(w0=w0, b0=b0, w1=w1, b1=b1, w2=w2, b2=b2)


def prepare_params(params):
    """One-time: zero-pad every dim up to a multiple of 128 lanes and cast weights
    to bf16 (f32 biases). Call once, reuse for every forward call."""
    dim_in = params["w0"].shape[0]
    dim_out = params["w2"].shape[1]
    din_p = _round_up(dim_in, LANE)
    h_p = _round_up(H, LANE)
    dout_p = _round_up(dim_out, LANE)

    def pad2(a, r, c, dt):
        return jnp.zeros((r, c), dt).at[: a.shape[0], : a.shape[1]].set(a.astype(dt))

    return dict(
        w0=pad2(params["w0"], din_p, h_p, jnp.bfloat16),
        b0=pad2(params["b0"], 1, h_p, jnp.float32),
        w1=pad2(params["w1"], h_p, h_p, jnp.bfloat16),
        b1=pad2(params["b1"], 1, h_p, jnp.float32),
        w2=pad2(params["w2"], h_p, dout_p, jnp.bfloat16),
        b2=pad2(params["b2"], 1, dout_p, jnp.float32),
    )


def create_dense_forward(x, pp, dim_out, *, block_b=512):
    """x: (B, dim_in) f32. pp: prepared (padded, bf16) params. Returns (B, dim_out) f32."""
    B, dim_in = x.shape
    din_p = pp["w0"].shape[0]
    h_p = pp["w1"].shape[0]
    dout_p = pp["w2"].shape[1]

    # Batch tile: multiple of 8 sublanes, capped so 2x-buffered x/out tiles stay
    # well under the v7x 64 MiB VMEM budget.
    tb = min(block_b, _round_up(B, SUBLANE))
    b_p = _round_up(B, tb)
    grid = (b_p // tb,)

    # Pad batch/feature dims and cast activations to bf16 (halves input DMA bytes).
    x_p = jnp.zeros((b_p, din_p), jnp.bfloat16).at[:B, :dim_in].set(
        x.astype(jnp.bfloat16))

    const = lambda i: (0, 0)  # weights/biases: resident, DMA'd once

    cost = pl.CostEstimate(
        flops=2 * b_p * (din_p * h_p + h_p * h_p + h_p * dout_p),
        transcendentals=b_p * h_p,
        bytes_accessed=(b_p * din_p * 2                       # x (bf16)
                        + b_p * dout_p * 4                    # out (f32)
                        + (din_p * h_p + h_p * h_p + h_p * dout_p) * 2  # weights
                        + (2 * h_p + dout_p) * 4),            # biases
    )

    out_p = pl.pallas_call(
        _mlp_kernel,
        out_shape=jax.ShapeDtypeStruct((b_p, dout_p), jnp.float32),
        grid=grid,
        in_specs=[
            pl.BlockSpec((tb, din_p), lambda i: (i, 0)),
            pl.BlockSpec((din_p, h_p), const),
            pl.BlockSpec((1, h_p), const),
            pl.BlockSpec((h_p, h_p), const),
            pl.BlockSpec((1, h_p), const),
            pl.BlockSpec((h_p, dout_p), const),
            pl.BlockSpec((1, dout_p), const),
        ],
        out_specs=pl.BlockSpec((tb, dout_p), lambda i: (i, 0)),
        compiler_params=pltpu.CompilerParams(
            dimension_semantics=("parallel",)),
        cost_estimate=cost,
    )(x_p, pp["w0"], pp["b0"], pp["w1"], pp["b1"], pp["w2"], pp["b2"])

    # Slice away batch / lane padding outside the kernel (lane-dense stores inside).
    return out_p[:B, :dim_out].astype(x.dtype)


def reference_forward(x, p):
    h0 = jnp.tanh(x @ p["w0"] + p["b0"])
    h1 = jnp.maximum(h0 @ p["w1"] + p["b1"], 0.0)
    return h1 @ p["w2"] + p["b2"]


if __name__ == "__main__":
    key = jax.random.PRNGKey(0)
    kx, kp = jax.random.split(key)

    B, dim_in, dim_out = 8, 32, 16
    x = jax.random.normal(kx, (B, dim_in), jnp.float32)
    params = init_params(kp, dim_in, dim_out)
    prepared = prepare_params(params)

    out = create_dense_forward(x, prepared, dim_out)
    out = jax.block_until_ready(out)

    ref = reference_forward(x, params)  # f32 reference
    assert out.shape == (B, dim_out)
    # bf16 MXU inputs with f32 accumulation: compare with a correspondingly loose tolerance.
    assert jnp.allclose(out, ref, atol=5e-2, rtol=5e-2), float(jnp.max(jnp.abs(out - ref)))

    print("KERNEL_OK")
</pallas_src>

<mosaic_0001>
module attributes {stable_mosaic.version = 11 : i64} {
  func.func @_mlp_kernel(%arg0: i32, %arg1: memref<8x128xbf16, #tpu.memory_space<vmem>>, %arg2: memref<128x128xbf16, #tpu.memory_space<vmem>>, %arg3: memref<1x128xf32, #tpu.memory_space<vmem>>, %arg4: memref<128x128xbf16, #tpu.memory_space<vmem>>, %arg5: memref<1x128xf32, #tpu.memory_space<vmem>>, %arg6: memref<128x128xbf16, #tpu.memory_space<vmem>>, %arg7: memref<1x128xf32, #tpu.memory_space<vmem>>, %arg8: memref<8x128xf32, #tpu.memory_space<vmem>>) attributes {dimension_semantics = [#tpu.dimension_semantics<parallel>], iteration_bounds = array<i64: 1>, scalar_prefetch = 0 : i64, scratch_operands = 0 : i64, tpu.core_type = #tpu.core_type<tc>, window_params = [{transform_indices = @transform_0, window_bounds = array<i64: 8, 128>}, {pipeline_mode = #tpu.pipeline_mode<synchronous>, transform_indices = @transform_1, window_bounds = array<i64: 128, 128>}, {pipeline_mode = #tpu.pipeline_mode<synchronous>, transform_indices = @transform_2, window_bounds = array<i64: 1, 128>}, {pipeline_mode = #tpu.pipeline_mode<synchronous>, transform_indices = @transform_3, window_bounds = array<i64: 128, 128>}, {pipeline_mode = #tpu.pipeline_mode<synchronous>, transform_indices = @transform_4, window_bounds = array<i64: 1, 128>}, {pipeline_mode = #tpu.pipeline_mode<synchronous>, transform_indices = @transform_5, window_bounds = array<i64: 128, 128>}, {pipeline_mode = #tpu.pipeline_mode<synchronous>, transform_indices = @transform_6, window_bounds = array<i64: 1, 128>}, {transform_indices = @transform_7, window_bounds = array<i64: 8, 128>}]} {
    %c0 = arith.constant 0 : index
    %c0_0 = arith.constant 0 : index
    %0 = vector.load %arg1[%c0, %c0_0] : memref<8x128xbf16, #tpu.memory_space<vmem>>, vector<8x128xbf16>
    %c0_1 = arith.constant 0 : index
    %c0_2 = arith.constant 0 : index
    %1 = vector.load %arg2[%c0_1, %c0_2] : memref<128x128xbf16, #tpu.memory_space<vmem>>, vector<128x128xbf16>
    %cst = arith.constant dense<0.000000e+00> : vector<8x128xf32>
    %2 = tpu.matmul %0, %1, %cst {dimension_numbers = #tpu.dot_dimension_numbers<[1], [0], [0], [1], [0, 0, 1, 1], [], []>} : vector<8x128xbf16>, vector<128x128xbf16>, vector<8x128xf32> -> vector<8x128xf32>
    %c0_3 = arith.constant 0 : index
    %c0_4 = arith.constant 0 : index
    %3 = vector.load %arg3[%c0_3, %c0_4] : memref<1x128xf32, #tpu.memory_space<vmem>>, vector<1x128xf32>
    %4 = vector.broadcast %3 : vector<1x128xf32> to vector<8x128xf32>
    %5 = arith.addf %2, %4 : vector<8x128xf32>
    %6 = math.tanh %5 : vector<8x128xf32>
    %7 = arith.truncf %6 : vector<8x128xf32> to vector<8x128xbf16>
    %c0_5 = arith.constant 0 : index
    %c0_6 = arith.constant 0 : index
    %8 = vector.load %arg4[%c0_5, %c0_6] : memref<128x128xbf16, #tpu.memory_space<vmem>>, vector<128x128xbf16>
    %cst_7 = arith.constant dense<0.000000e+00> : vector<8x128xf32>
    %9 = tpu.matmul %7, %8, %cst_7 {dimension_numbers = #tpu.dot_dimension_numbers<[1], [0], [0], [1], [0, 0, 1, 1], [], []>} : vector<8x128xbf16>, vector<128x128xbf16>, vector<8x128xf32> -> vector<8x128xf32>
    %c0_8 = arith.constant 0 : index
    %c0_9 = arith.constant 0 : index
    %10 = vector.load %arg5[%c0_8, %c0_9] : memref<1x128xf32, #tpu.memory_space<vmem>>, vector<1x128xf32>
    %11 = vector.broadcast %10 : vector<1x128xf32> to vector<8x128xf32>
    %12 = arith.addf %9, %11 : vector<8x128xf32>
    %cst_10 = arith.constant 0.000000e+00 : f32
    %13 = vector.broadcast %cst_10 : f32 to vector<8x128xf32>
    %14 = arith.maximumf %12, %13 : vector<8x128xf32>
    %15 = arith.truncf %14 : vector<8x128xf32> to vector<8x128xbf16>
    %c0_11 = arith.constant 0 : index
    %c0_12 = arith.constant 0 : index
    %16 = vector.load %arg6[%c0_11, %c0_12] : memref<128x128xbf16, #tpu.memory_space<vmem>>, vector<128x128xbf16>
    %cst_13 = arith.constant dense<0.000000e+00> : vector<8x128xf32>
    %17 = tpu.matmul %15, %16, %cst_13 {dimension_numbers = #tpu.dot_dimension_numbers<[1], [0], [0], [1], [0, 0, 1, 1], [], []>} : vector<8x128xbf16>, vector<128x128xbf16>, vector<8x128xf32> -> vector<8x128xf32>
    %c0_14 = arith.constant 0 : index
    %c0_15 = arith.constant 0 : index
    %18 = vector.load %arg7[%c0_14, %c0_15] : memref<1x128xf32, #tpu.memory_space<vmem>>, vector<1x128xf32>
    %19 = vector.broadcast %18 : vector<1x128xf32> to vector<8x128xf32>
    %20 = arith.addf %17, %19 : vector<8x128xf32>
    %c0_16 = arith.constant 0 : index
    %c0_17 = arith.constant 0 : index
    %21 = vector.load %arg8[%c0_16, %c0_17] : memref<8x128xf32, #tpu.memory_space<vmem>>, vector<8x128xf32>
    tpu.vector_store %arg8[%c0_16, %c0_17], %20 {strides = array<i32>} : memref<8x128xf32, #tpu.memory_space<vmem>>, vector<8x128xf32>,
    return
  }
  func.func @transform_0(%arg0: i32) -> (i32, i32) {
    %c0_i32 = arith.constant 0 : i32
    %c0_i32_0 = arith.constant 0 : i32
    return %arg0, %c0_i32 : i32, i32
  }
  func.func @transform_1(%arg0: i32) -> (i32, i32) {
    %c0_i32 = arith.constant 0 : i32
    %c0_i32_0 = arith.constant 0 : i32
    %c0_i32_1 = arith.constant 0 : i32
    return %c0_i32, %c0_i32_0 : i32, i32
  }
  func.func @transform_2(%arg0: i32) -> (i32, i32) {
    %c0_i32 = arith.constant 0 : i32
    %c0_i32_0 = arith.constant 0 : i32
    %c0_i32_1 = arith.constant 0 : i32
    return %c0_i32, %c0_i32_0 : i32, i32
  }
  func.func @transform_3(%arg0: i32) -> (i32, i32) {
    %c0_i32 = arith.constant 0 : i32
    %c0_i32_0 = arith.constant 0 : i32
    %c0_i32_1 = arith.constant 0 : i32
    return %c0_i32, %c0_i32_0 : i32, i32
  }
  func.func @transform_4(%arg0: i32) -> (i32, i32) {
    %c0_i32 = arith.constant 0 : i32
    %c0_i32_0 = arith.constant 0 : i32
    %c0_i32_1 = arith.constant 0 : i32
    return %c0_i32, %c0_i32_0 : i32, i32
  }
  func.func @transform_5(%arg0: i32) -> (i32, i32) {
    %c0_i32 = arith.constant 0 : i32
    %c0_i32_0 = arith.constant 0 : i32
    %c0_i32_1 = arith.constant 0 : i32
    return %c0_i32, %c0_i32_0 : i32, i32
  }
  func.func @transform_6(%arg0: i32) -> (i32, i32) {
    %c0_i32 = arith.constant 0 : i32
    %c0_i32_0 = arith.constant 0 : i32
    %c0_i32_1 = arith.constant 0 : i32
    return %c0_i32, %c0_i32_0 : i32, i32
  }
  func.func @transform_7(%arg0: i32) -> (i32, i32) {
    %c0_i32 = arith.constant 0 : i32
    %c0_i32_0 = arith.constant 0 : i32
    return %arg0, %c0_i32 : i32, i32
  }
}

</mosaic_0001>

<bundles_post_ra>
// kernel: tpu_custom_call.1
= control target key start
LH: loop header
LB: loop body
LE: loop exit
PB: predicated region body
PF: predicated region fallthrough
CT: control target
= control target key end

     0   :  { %12 = vsyncpa [#allocation3], 0  ;;  %s861_s0 = inlined_call_operand.hbm [shape: bf16[8,128], index: 0, kind: input, shape index: {}]   ;;  %s862_s1 = inlined_call_operand.hbm [shape: bf16[128,128], index: 1, kind: input, shape index: {}]   ;;  %s863_s2 = inlined_call_operand.vmem [shape: f32[1,128], index: 2, kind: input, shape index: {}]   ;;  %s864_s3 = inlined_call_operand.hbm [shape: bf16[128,128], index: 3, kind: input, shape index: {}]   ;;  %s865_s4 = inlined_call_operand.vmem [shape: f32[1,128], index: 4, kind: input, shape index: {}]   ;;  %s866_s5 = inlined_call_operand.hbm [shape: bf16[128,128], index: 5, kind: input, shape index: {}]   ;;  %s867_s6 = inlined_call_operand.vmem [shape: f32[1,128], index: 6, kind: input, shape index: {}]   ;;  %s868_s7 = inlined_call_operand.hbm [shape: f32[8,128], index: 7, kind: output, shape index: {}]  }
   0x1   :  { %13 = vsyncpa [#allocation6], 0 }
   0x2   :  { %14 = vsyncpa [#allocation9], 0 }
   0x3   :  { %15 = vsyncpa [#allocation4], 0  ;;  %s704_s24 = smov [#allocation5]   ;;  %s586_s28 = scalar_lea.hbm %s862_s1, 1024 }
   0x4   :  { %s31_s25 = sshll.u32 %s704_s24, 4  ;;  %p587_p0 = scmp.ne.s32.totalorder %s862_s1, %s586_s28  ;;  %s32_s25 = int_to_ptr.vmem [resolvable:$true] %s31_s25 }
   0x5   :  { %p590_p1 = scmp.lt.u32.totalorder %s586_s28, %s862_s1 }
   0x7   :  { %p592_p2 = pnand %p590_p1, %p587_p0 }
   0x9   :  { %595 = shalt.err (!%p592_p2)
}
   0xa   :  { %s596_s10 = scalar_lea.vmem %s32_s25, 1024  ;;  %p601_p4 = scmp.lt.s32.totalorder %s32_s25, %s32_s25 }
   0xb   :  { %p597_p3 = scmp.ne.s32.totalorder %s32_s25, %s596_s10  ;;  %p602_p5 = scmp.lt.s32.totalorder %s596_s10, %s596_s10 }
   0xd   :  { %p603_p6 = por %p602_p5, %p601_p4 }
   0xf   :  { %p604_p7 = pnand %p603_p6, %p597_p3 }
  0x11   :  { %607 = shalt.err (!%p604_p7)
}
  0x12   :  { %s705_s11 = smov 64   ;;  %s706_s12 = smov 4  }
  0x13   :  { %37 = dma.hbm_to_vmem [thread:$0]  %s862_s1, 1024, %s32_s25, [#allocation6], %s705_s11, %s705_s11, %s706_s12  }
  0x14   :  { %s707_s15 = smov [#allocation2]   ;;  %s708_s17 = smov [#allocation7]  }
  0x15   :  { %s22_s16 = sshll.u32 %s707_s15, 4  ;;  %s45_s18 = sshll.u32 %s708_s17, 4  ;;  %s23_s16 = int_to_ptr.vmem [resolvable:$true] %s22_s16  ;;  %s46_s18 = int_to_ptr.vmem [resolvable:$true] %s45_s18 }
  0x16   :  { %s608_s21 = scalar_lea.hbm %s861_s0, 64 }
  0x17   :  { %p609_p8 = scmp.ne.s32.totalorder %s861_s0, %s608_s21  ;;  %p612_p9 = scmp.lt.u32.totalorder %s608_s21, %s861_s0 }
  0x19   :  { %p614_p10 = pnand %p612_p9, %p609_p8 }
  0x1b   :  { %617 = shalt.err (!%p614_p10)
}
  0x1c   :  { %s618_s1 = scalar_lea.vmem %s23_s16, 64  ;;  %p623_p12 = scmp.lt.s32.totalorder %s23_s16, %s23_s16 }
  0x1d   :  { %p619_p11 = scmp.ne.s32.totalorder %s23_s16, %s618_s1  ;;  %p624_p13 = scmp.lt.s32.totalorder %s618_s1, %s618_s1 }
  0x1f   :  { %p625_p0 = por %p624_p13, %p623_p12 }
  0x21   :  { %p626_p1 = pnand %p625_p0, %p619_p11 }
  0x23   :  { %629 = shalt.err (!%p626_p1)
}
  0x24   :  { %25 = dma.hbm_to_vmem [thread:$0]  %s861_s0, 64, %s23_s16, [#allocation3]  }
  0x25   :  { %s630_s30 = scalar_lea.hbm %s864_s3, 1024 }
  0x26   :  { %p631_p2 = scmp.ne.s32.totalorder %s864_s3, %s630_s30  ;;  %p634_p3 = scmp.lt.u32.totalorder %s630_s30, %s864_s3 }
  0x28   :  { %p636_p4 = pnand %p634_p3, %p631_p2 }
  0x2a   :  { %639 = shalt.err (!%p636_p4)
}
  0x2b   :  { %s640_s14 = scalar_lea.vmem %s46_s18, 1024  ;;  %p645_p6 = scmp.lt.s32.totalorder %s46_s18, %s46_s18 }
  0x2c   :  { %p641_p5 = scmp.ne.s32.totalorder %s46_s18, %s640_s14  ;;  %p646_p7 = scmp.lt.s32.totalorder %s640_s14, %s640_s14 }
  0x2e   :  { %p647_p8 = por %p646_p7, %p645_p6 }
  0x30   :  { %p648_p9 = pnand %p647_p8, %p641_p5 }
  0x32   :  { %651 = shalt.err (!%p648_p9)
}
  0x33   :  { %51 = dma.hbm_to_vmem [thread:$0]  %s864_s3, 1024, %s46_s18, [#allocation6], %s705_s11, %s705_s11, %s706_s12  }
  0x34   :  { %s709_s16 = smov [#allocation8]   ;;  %s652_s21 = scalar_lea.hbm %s866_s5, 1024 }
  0x35   :  { %s59_s17 = sshll.u32 %s709_s16, 4  ;;  %p653_p10 = scmp.ne.s32.totalorder %s866_s5, %s652_s21  ;;  %s60_s17 = int_to_ptr.vmem [resolvable:$true] %s59_s17 }
  0x36   :  { %p656_p11 = scmp.lt.u32.totalorder %s652_s21, %s866_s5 }
  0x38   :  { %p658_p12 = pnand %p656_p11, %p653_p10 }
  0x3a   :  { %661 = shalt.err (!%p658_p12)
}
  0x3b   :  { %s662_s1 = scalar_lea.vmem %s60_s17, 1024  ;;  %p667_p0 = scmp.lt.s32.totalorder %s60_s17, %s60_s17 }
  0x3c   :  { %p663_p13 = scmp.ne.s32.totalorder %s60_s17, %s662_s1  ;;  %p668_p1 = scmp.lt.s32.totalorder %s662_s1, %s662_s1 }
  0x3e   :  { %p669_p2 = por %p668_p1, %p667_p0 }
  0x40   :  { %p670_p3 = pnand %p669_p2, %p663_p13 }
  0x42   :  { %673 = shalt.err (!%p670_p3)
}
  0x43   :  { %65 = dma.hbm_to_vmem [thread:$0]  %s866_s5, 1024, %s60_s17, [#allocation9], %s705_s11, %s705_s11, %s706_s12  }
  0x44   :  { %696 = dma.done.wait [#allocation3], 64  }
  0x45   :  { %697 = vsyncadd [#allocation3], 4294967232 }
  0x46   :  { %698 = dma.done.wait [#allocation6], 2048  }
  0x47   :  { %699 = vsyncadd [#allocation6], 4294965248 }
  0x48   :  { %700 = dma.done.wait [#allocation9], 1024  }
  0x49   :  { %701 = vsyncadd [#allocation9], 4294966272  ;;  %v710_v0 = vmov 0.0   ;;  %vm711_vm0 = vmmov 0   ;;  %v560_v1 = vld [vmem:[#allocation5] sm:$0xff]   ;;  %v561_v2 = vld [vmem:[#allocation5 + $0x8] sm:$0xff]  }
  0x4a   :  { %491 = vmatprep.subr.bf16.mxu0 %v710_v0  ;;  %507 = vmatprep.mubr.msk.bf16.mxu0 %vm711_vm0, %v710_v0  ;;  %v562_v3 = vld [vmem:[#allocation5 + $0x10] sm:$0xff]   ;;  %v568_v4 = vld [vmem:[#allocation7] sm:$0xff]   ;;  %v563_v5 = vld [vmem:[#allocation5 + $0x18] sm:$0xff]   ;;  %s712_s28 = smov [#allocation10]  }
  0x4b   :  { %511 = vmatprep.subr.bf16.mxu1 %v710_v0  ;;  %527 = vmatprep.mubr.msk.bf16.mxu1 %vm711_vm0, %v710_v0  ;;  %v569_v6 = vld [vmem:[#allocation7 + $0x8] sm:$0xff]   ;;  %v564_v7 = vld [vmem:[#allocation5 + $0x20] sm:$0xff]   ;;  %v570_v8 = vld [vmem:[#allocation7 + $0x10] sm:$0xff]   ;;  %s426_s29 = sshll.u32 %s712_s28, 4  ;;  %s427_s29 = int_to_ptr.vmem [resolvable:$true] %s426_s29 }
  0x4c   :  { %492 = vmatpush3.bf16.msra.mxu0 %v560_v1  ;;  %512 = vmatpush3.bf16.msra.mxu1 %v568_v4  ;;  %v565_v9 = vld [vmem:[#allocation5 + $0x28] sm:$0xff]   ;;  %v571_v10 = vld [vmem:[#allocation7 + $0x18] sm:$0xff]   ;;  %v566_v11 = vld [vmem:[#allocation5 + $0x30] sm:$0xff]   ;;  %p679_p5 = scmp.lt.s32.totalorder %s427_s29, %s427_s29 }
  0x4d   :  { %493 = vmatprep.subr.bf16.mxu0 %v710_v0  ;;  %513 = vmatprep.subr.bf16.mxu1 %v710_v0  ;;  %v567_v12 = vld [vmem:[#allocation5 + $0x38] sm:$0xff]   ;;  %v572_v14 = vld [vmem:[#allocation7 + $0x20] sm:$0xff]   ;;  %v573_v15 = vld [vmem:[#allocation7 + $0x28] sm:$0xff]  }
  0x4e   :  { %v81_v13 = vld [vmem:[#allocation2] sm:$0xf]  ;;  %v574_v16 = vld [vmem:[#allocation7 + $0x30] sm:$0xff]   ;;  %v576_v18 = vld [vmem:[#allocation8] sm:$0xff]  }
  0x4f   :  { %v575_v17 = vld [vmem:[#allocation7 + $0x38] sm:$0xff]   ;;  %v577_v19 = vld [vmem:[#allocation8 + $0x8] sm:$0xff]   ;;  %v578_v20 = vld [vmem:[#allocation8 + $0x10] sm:$0xff]  }
  0x50   :  { %494 = vmatpush3.bf16.msra.mxu0 %v561_v2  ;;  %514 = vmatpush3.bf16.msra.mxu1 %v569_v6  ;;  %v579_v21 = vld [vmem:[#allocation8 + $0x18] sm:$0xff]   ;;  %v580_v22 = vld [vmem:[#allocation8 + $0x20] sm:$0xff]   ;;  %v581_v23 = vld [vmem:[#allocation8 + $0x28] sm:$0xff]  }
  0x51   :  { %495 = vmatprep.subr.bf16.mxu0 %v710_v0  ;;  %515 = vmatprep.subr.bf16.mxu1 %v710_v0  ;;  %v437_v24 = vld [vmem:[%s863_s2] ss:$0 sm:$0xff]  ;;  %v582_v32 = vld [vmem:[#allocation8 + $0x30] sm:$0xff]  }
  0x52   :  { %v583_v33 = vld [vmem:[#allocation8 + $0x38] sm:$0xff]  }
  0x53   :  { %v446_v34 = vld [vmem:[%s865_s4] ss:$0 sm:$0xff]  ;;  %s674_s4 = scalar_lea.vmem %s427_s29, 128 }
  0x54   :  { %496 = vmatpush3.bf16.msra.mxu0 %v562_v3  ;;  %516 = vmatpush3.bf16.msra.mxu1 %v570_v8  ;;  %v455_v42 = vld [vmem:[%s867_s6] ss:$0 sm:$0xff]  ;;  %p675_p4 = scmp.ne.s32.totalorder %s427_s29, %s674_s4  ;;  %p680_p6 = scmp.lt.s32.totalorder %s674_s4, %s674_s4 }
  0x55   :  { %497 = vmatprep.subr.bf16.mxu0 %v710_v0  ;;  %517 = vmatprep.subr.bf16.mxu1 %v710_v0 }
  0x56   :  { %p681_p7 = por %p680_p6, %p679_p5 }
  0x58   :  { %498 = vmatpush3.bf16.msra.mxu0 %v563_v5  ;;  %518 = vmatpush3.bf16.msra.mxu1 %v571_v10  ;;  %p682_p8 = pnand %p681_p7, %p675_p4 }
  0x59   :  { %499 = vmatprep.subr.bf16.mxu0 %v710_v0  ;;  %519 = vmatprep.subr.bf16.mxu1 %v710_v0 }
  0x5c   :  { %500 = vmatpush3.bf16.msra.mxu0 %v564_v7  ;;  %520 = vmatpush3.bf16.msra.mxu1 %v572_v14 }
  0x5d   :  { %501 = vmatprep.subr.bf16.mxu0 %v710_v0  ;;  %521 = vmatprep.subr.bf16.mxu1 %v710_v0 }
  0x60   :  { %502 = vmatpush3.bf16.msra.mxu0 %v565_v9  ;;  %522 = vmatpush3.bf16.msra.mxu1 %v573_v15 }
  0x61   :  { %503 = vmatprep.subr.bf16.mxu0 %v710_v0  ;;  %523 = vmatprep.subr.bf16.mxu1 %v710_v0 }
  0x64   :  { %504 = vmatpush3.bf16.msra.mxu0 %v566_v11  ;;  %524 = vmatpush3.bf16.msra.mxu1 %v574_v16 }
  0x65   :  { %505 = vmatprep.subr.bf16.mxu0 %v710_v0  ;;  %525 = vmatprep.subr.bf16.mxu1 %v710_v0 }
  0x68   :  { %506 = vmatpush3.bf16.msra.mxu0 %v567_v12  ;;  %526 = vmatpush3.bf16.msra.mxu1 %v575_v17 }
  0x69   :  { %531 = vmatprep.subr.bf16.mxu0 %v710_v0 }
  0x6b   :  { %508 = vmatmul.mubr.bf16.vlgmr.msra.gmra.mrb[0].mxu0 %v81_v13 }
  0x6c   :  { %547 = vmatprep.mubr.msk.bf16.mxu0 %vm711_vm0, %v710_v0  ;;  %532 = vmatpush3.bf16.msra.mxu0 %v576_v18 }
  0x6d   :  { %533 = vmatprep.subr.bf16.mxu0 %v710_v0 }
  0x70   :  { %534 = vmatpush3.bf16.msra.mxu0 %v577_v19 }
  0x71   :  { %535 = vmatprep.subr.bf16.mxu0 %v710_v0 }
  0x74   :  { %536 = vmatpush3.bf16.msra.mxu0 %v578_v20 }
  0x75   :  { %537 = vmatprep.subr.bf16.mxu0 %v710_v0 }
  0x78   :  { %538 = vmatpush3.bf16.msra.mxu0 %v579_v21 }
  0x79   :  { %539 = vmatprep.subr.bf16.mxu0 %v710_v0 }
  0x7c   :  { %540 = vmatpush3.bf16.msra.mxu0 %v580_v22 }
  0x7d   :  { %541 = vmatprep.subr.bf16.mxu0 %v710_v0 }
  0x80   :  { %542 = vmatpush3.bf16.msra.mxu0 %v581_v23 }
  0x81   :  { %543 = vmatprep.subr.bf16.mxu0 %v710_v0 }
  0x84   :  { %544 = vmatpush3.bf16.msra.mxu0 %v582_v32 }
  0x85   :  { %545 = vmatprep.subr.bf16.mxu0 %v710_v0 }
  0x88   :  { %546 = vmatpush3.bf16.msra.mxu0 %v583_v33 }
 0x13e   :  { %v187_v25 = vpop.f32.mrb[0].mxu0 }
 0x13f   :  { %v188_v26 = vadd.f32 %v437_v24, %v187_v25  ;;  %v509_v27 = vpop.f32.mrb[1].mxu0 }
 0x140   :  { %v190_v28 = vpop.f32.mrb[2].mxu0 }
 0x141   :  { %584 = vtanh.f32 %v188_v26  ;;  %v510_v29 = vpop.f32.mrb[3].mxu0 }
 0x14b   :  { %v585_v30 = vpop.eup %584 }
 0x14c   :  { %v194_v31 = vpack.c.bf16 %v585_v30, %v585_v30 }
 0x14e   :  { %528 = vmatmul.mubr.bf16.vlgmr.msra.gmra.mrb[0].mxu1 %v194_v31 }
 0x221   :  { %v300_v35 = vpop.f32.mrb[0].mxu1 }
 0x222   :  { %v301_v36 = vadd.f32 %v446_v34, %v300_v35  ;;  %v529_v37 = vpop.f32.mrb[1].mxu1 }
 0x223   :  { %v303_v38 = vpop.f32.mrb[2].mxu1 }
 0x224   :  { %v306_v39 = vmax.f32 %v301_v36, 0.0  ;;  %v530_v40 = vpop.f32.mrb[3].mxu1 }
 0x226   :  { %v307_v41 = vpack.c.bf16 %v306_v39, %v306_v39 }
 0x228   :  { %548 = vmatmul.mubr.bf16.vlgmr.msra.gmra.mrb[4].mxu0 %v307_v41 }
 0x2fb   :  { %v413_v43 = vpop.f32.mrb[4].mxu0 }
 0x2fc   :  { %v414_v44 = vadd.f32 %v455_v42, %v413_v43  ;;  %v549_v45 = vpop.f32.mrb[5].mxu0 }
 0x2fd   :  { %v416_v46 = vpop.f32.mrb[6].mxu0 }
 0x2fe   :  { %419 = vst [vmem:[#allocation10] sm:$0xff] %v414_v44  ;;  %v550_v47 = vpop.f32.mrb[7].mxu0 }
 0x2ff   :  { %685 = shalt.err (!%p682_p8)
}
 0x300   :  { %s686_s6 = scalar_lea.hbm %s868_s7, 128 }
 0x301   :  { %p687_p9 = scmp.ne.s32.totalorder %s868_s7, %s686_s6  ;;  %p690_p10 = scmp.lt.u32.totalorder %s686_s6, %s868_s7 }
 0x303   :  { %p692_p11 = pnand %p690_p10, %p687_p9 }
 0x305   :  { %695 = shalt.err (!%p692_p11)
}
 0x306   :  { %429 = dma.vmem_to_hbm [thread:$0]  %s427_s29, 128, %s868_s7, [#allocation4]  }
 0x307   :  { %702 = dma.done.wait [#allocation4], 128  }
 0x308   :  { %703 = vsyncadd [#allocation4], 4294967168 }
 0x309   :  { %433 = vsyncpa [#allocation3], 1 }
 0x30a   :  { %434 = vsyncpa [#allocation6], 1 }
 0x30b   :  { %435 = vsyncpa [#allocation9], 1 }
 0x30c   :  { %436 = vsyncpa [#allocation4], 1 }

</bundles_post_ra>
